<compile_context>
chip_gen: v7x
topology: tpu7x:2x2x1
jax: 0.10.0
libtpu: 0.0.40
codegen_flags: <defaults>
</compile_context>

<pallas_src>
import functools
import math

import jax
import jax.numpy as jnp
from jax import lax
from jax.experimental import pallas as pl
from jax.experimental.pallas import tpu as pltpu


def _round_up(x, m):
    return (x + m - 1) // m * m


def _sha_kernel(q_ref, k_ref, v_ref, out_ref, attn_ref, *, scale):
    # q_ref:    (TQ, D)      query tile, native dtype (bf16 feeds the MXU at full rate)
    # k_ref:    (Lk, D)      keys, resident across the grid
    # v_ref:    (B*Dv, Lk)   values in the torch bmm layout, resident
    # out_ref:  (B*Dv, TQ)   lane-dense output tile (TQ is a multiple of 128)
    # attn_ref: (TQ, Lk)     attention rows for this query tile
    q = q_ref[...]
    # Fold the 1/sqrt(d_model) scale into q: a (TQ, D) multiply instead of (TQ, Lk).
    q = q * jnp.asarray(scale, dtype=q.dtype)

    # scores (TQ, Lk): contract the last axes of q and k (no explicit transpose);
    # MXU consumes the native (bf16) operands and accumulates in f32.
    scores = lax.dot_general(
        q, k_ref[...],
        dimension_numbers=(((1,), (1,)), ((), ())),
        preferred_element_type=jnp.float32)

    # Softmax over the key axis, in f32 on the VPU; denominator reciprocal on the EUP.
    m = jnp.max(scores, axis=-1, keepdims=True)
    e = jnp.exp(scores - m)
    attn = e * pl.reciprocal(jnp.sum(e, axis=-1, keepdims=True), approx=True)
    attn_ref[...] = attn.astype(attn_ref.dtype)

    # out (B*Dv, TQ): contract the last axes of v_flat and attn (== v_flat @ attn^T
    # without materializing the transpose); attn is cast to v's dtype for the MXU.
    out = lax.dot_general(
        v_ref[...], attn.astype(v_ref.dtype),
        dimension_numbers=(((1,), (1,)), ((), ())),
        preferred_element_type=jnp.float32)
    out_ref[...] = out.astype(out_ref.dtype)


def single_head_attention(q, k, v, *, tile_q=128):
    """Fused SingleHeadAttention forward.

    q: (len_q, d_model)
    k: (len_k, d_model)
    v: (sz_b, len_v, d_v) with len_v == len_k
    returns (output (sz_b, len_q, d_v), attn (len_q, len_k))
    """
    Lq, D = q.shape
    Lk, Dk = k.shape
    B, Lv, Dv = v.shape
    assert Dk == D and Lv == Lk

    scale = 1.0 / math.sqrt(float(D))

    # Pad the query axis so each output tile is lane-dense (multiple of 128).
    # Padded (zero) query rows just yield a uniform softmax row; sliced off below.
    tile_q = max(128, _round_up(tile_q, 128))
    lq_pad = _round_up(max(Lq, tile_q), tile_q)
    if lq_pad != Lq:
        q = jnp.pad(q, ((0, lq_pad - Lq), (0, 0)))

    # Same value layout the torch module feeds to its bmm: (sz_b * d_v, len_v).
    v_flat = jnp.transpose(v, (0, 2, 1)).reshape(B * Dv, Lk)

    grid = (lq_pad // tile_q,)

    # VMEM budget: resident k & v_flat, double-buffered q/out/attn tiles, f32 scratch.
    isz = lambda a: jnp.dtype(a.dtype).itemsize
    est = (2 * tile_q * D * isz(q)
           + 2 * Lk * D * isz(k)
           + 2 * (B * Dv) * Lk * isz(v)
           + 2 * (B * Dv) * tile_q * isz(v)
           + 2 * tile_q * Lk * isz(q)
           + 4 * tile_q * Lk * 4)
    vmem_limit = int(min(max(2 * est, 32 * 1024 * 1024), 48 * 1024 * 1024))

    out_flat, attn = pl.pallas_call(
        functools.partial(_sha_kernel, scale=scale),
        out_shape=(
            jax.ShapeDtypeStruct((B * Dv, lq_pad), v.dtype),
            jax.ShapeDtypeStruct((lq_pad, Lk), q.dtype),
        ),
        grid=grid,
        in_specs=[
            pl.BlockSpec((tile_q, D), lambda i: (i, 0)),       # q tile (pipelined)
            pl.BlockSpec((Lk, D), lambda i: (0, 0)),           # k resident
            pl.BlockSpec((B * Dv, Lk), lambda i: (0, 0)),      # v_flat resident
        ],
        out_specs=(
            pl.BlockSpec((B * Dv, tile_q), lambda i: (0, i)),  # lane-dense output tile
            pl.BlockSpec((tile_q, Lk), lambda i: (i, 0)),      # attention rows
        ),
        compiler_params=pltpu.CompilerParams(
            dimension_semantics=("parallel",),  # query tiles shard across v7x's 2 TCs
            vmem_limit_bytes=vmem_limit,
        ),
    )(q, k, v_flat)

    # Back to the module's output layout: (sz_b, len_q, d_v).
    output = jnp.transpose(out_flat[:, :Lq].reshape(B, Dv, Lq), (0, 2, 1))
    return output, attn[:Lq]


def _reference(q, k, v):
    qf, kf, vf = (x.astype(jnp.float32) for x in (q, k, v))
    d = qf.shape[-1]
    scores = (qf @ kf.T) / jnp.sqrt(jnp.float32(d))
    attn = jax.nn.softmax(scores, axis=-1)               # (len_q, len_k)
    out = jnp.einsum("qm,bmd->bqd", attn, vf)            # (sz_b, len_q, d_v)
    return out, attn


if __name__ == "__main__":
    # Shapes implied by the module: sz_b=2, len_q=8, len_k=len_v=16, d_v=4, d_model=32.
    B, Lq, Lk, Dv, D = 2, 8, 16, 4, 32
    key = jax.random.PRNGKey(0)
    kq, kk, kv = jax.random.split(key, 3)

    # bf16 activations feed the MXU at full rate on v5e/v6e/v7x.
    q = jax.random.normal(kq, (Lq, D), dtype=jnp.float32).astype(jnp.bfloat16)
    k = jax.random.normal(kk, (Lk, D), dtype=jnp.float32).astype(jnp.bfloat16)
    v = jax.random.normal(kv, (B, Lk, Dv), dtype=jnp.float32).astype(jnp.bfloat16)

    out, attn = single_head_attention(q, k, v)
    out = jax.block_until_ready(out)
    attn = jax.block_until_ready(attn)

    ref_out, ref_attn = _reference(q, k, v)
    assert out.shape == (B, Lq, Dv)
    assert attn.shape == (Lq, Lk)
    # bf16 MXU operands + approx reciprocal => loosened tolerance vs the f32 reference.
    assert jnp.allclose(out.astype(jnp.float32), ref_out, atol=5e-2, rtol=5e-2)
    assert jnp.allclose(attn.astype(jnp.float32), ref_attn, atol=2e-2, rtol=2e-2)

    print("KERNEL_OK")
</pallas_src>

<mosaic_0001>
module attributes {stable_mosaic.version = 11 : i64} {
  func.func @_sha_kernel(%arg0: i32, %arg1: memref<128x32xbf16, #tpu.memory_space<vmem>>, %arg2: memref<16x32xbf16, #tpu.memory_space<vmem>>, %arg3: memref<8x16xbf16, #tpu.memory_space<vmem>>, %arg4: memref<8x128xbf16, #tpu.memory_space<vmem>>, %arg5: memref<128x16xbf16, #tpu.memory_space<vmem>>) attributes {dimension_semantics = [#tpu.dimension_semantics<parallel>], iteration_bounds = array<i64: 1>, scalar_prefetch = 0 : i64, scratch_operands = 0 : i64, tpu.core_type = #tpu.core_type<tc>, window_params = [{transform_indices = @transform_0, window_bounds = array<i64: 128, 32>}, {pipeline_mode = #tpu.pipeline_mode<synchronous>, transform_indices = @transform_1, window_bounds = array<i64: 16, 32>}, {pipeline_mode = #tpu.pipeline_mode<synchronous>, transform_indices = @transform_2, window_bounds = array<i64: 8, 16>}, {transform_indices = @transform_3, window_bounds = array<i64: 8, 128>}, {transform_indices = @transform_4, window_bounds = array<i64: 128, 16>}]} {
    %c0 = arith.constant 0 : index
    %c0_0 = arith.constant 0 : index
    %0 = vector.load %arg1[%c0, %c0_0] : memref<128x32xbf16, #tpu.memory_space<vmem>>, vector<128x32xbf16>
    %cst = arith.constant 1.767580e-01 : bf16
    %1 = vector.broadcast %cst : bf16 to vector<128x32xbf16>
    %2 = arith.mulf %0, %1 : vector<128x32xbf16>
    %c0_1 = arith.constant 0 : index
    %c0_2 = arith.constant 0 : index
    %3 = vector.load %arg2[%c0_1, %c0_2] : memref<16x32xbf16, #tpu.memory_space<vmem>>, vector<16x32xbf16>
    %cst_3 = arith.constant dense<0.000000e+00> : vector<128x16xf32>
    %4 = tpu.matmul %2, %3, %cst_3 {dimension_numbers = #tpu.dot_dimension_numbers<[1], [1], [0], [0], [0, 0, 1, 0], [], []>} : vector<128x32xbf16>, vector<16x32xbf16>, vector<128x16xf32> -> vector<128x16xf32>
    %cst_4 = arith.constant dense<0xFF800000> : vector<128xf32>
    %5 = vector.multi_reduction <maximumf>, %4, %cst_4 [1] : vector<128x16xf32> to vector<128xf32>
    %6 = vector.shape_cast %5 : vector<128xf32> to vector<128x1xf32>
    %7 = vector.broadcast %6 : vector<128x1xf32> to vector<128x16xf32>
    %8 = arith.subf %4, %7 : vector<128x16xf32>
    %9 = math.exp %8 : vector<128x16xf32>
    %cst_5 = arith.constant dense<0.000000e+00> : vector<128xf32>
    %10 = vector.multi_reduction <add>, %9, %cst_5 [1] : vector<128x16xf32> to vector<128xf32>
    %11 = vector.shape_cast %10 : vector<128xf32> to vector<128x1xf32>
    %12 = tpu.reciprocal %11 {approx = true} : vector<128x1xf32> -> vector<128x1xf32>
    %13 = vector.broadcast %12 : vector<128x1xf32> to vector<128x16xf32>
    %14 = arith.mulf %9, %13 : vector<128x16xf32>
    %15 = arith.truncf %14 : vector<128x16xf32> to vector<128x16xbf16>
    %c0_6 = arith.constant 0 : index
    %c0_7 = arith.constant 0 : index
    %16 = vector.load %arg5[%c0_6, %c0_7] : memref<128x16xbf16, #tpu.memory_space<vmem>>, vector<128x16xbf16>
    tpu.vector_store %arg5[%c0_6, %c0_7], %15 {strides = array<i32>} : memref<128x16xbf16, #tpu.memory_space<vmem>>, vector<128x16xbf16>,
    %c0_8 = arith.constant 0 : index
    %c0_9 = arith.constant 0 : index
    %17 = vector.load %arg3[%c0_8, %c0_9] : memref<8x16xbf16, #tpu.memory_space<vmem>>, vector<8x16xbf16>
    %18 = arith.truncf %14 : vector<128x16xf32> to vector<128x16xbf16>
    %cst_10 = arith.constant dense<0.000000e+00> : vector<8x128xf32>
    %19 = tpu.matmul %17, %18, %cst_10 {dimension_numbers = #tpu.dot_dimension_numbers<[1], [1], [0], [0], [0, 0, 1, 0], [], []>} : vector<8x16xbf16>, vector<128x16xbf16>, vector<8x128xf32> -> vector<8x128xf32>
    %20 = arith.truncf %19 : vector<8x128xf32> to vector<8x128xbf16>
    %c0_11 = arith.constant 0 : index
    %c0_12 = arith.constant 0 : index
    %21 = vector.load %arg4[%c0_11, %c0_12] : memref<8x128xbf16, #tpu.memory_space<vmem>>, vector<8x128xbf16>
    tpu.vector_store %arg4[%c0_11, %c0_12], %20 {strides = array<i32>} : memref<8x128xbf16, #tpu.memory_space<vmem>>, vector<8x128xbf16>,
    return
  }
  func.func @transform_0(%arg0: i32) -> (i32, i32) {
    %c0_i32 = arith.constant 0 : i32
    %c0_i32_0 = arith.constant 0 : i32
    return %arg0, %c0_i32 : i32, i32
  }
  func.func @transform_1(%arg0: i32) -> (i32, i32) {
    %c0_i32 = arith.constant 0 : i32
    %c0_i32_0 = arith.constant 0 : i32
    %c0_i32_1 = arith.constant 0 : i32
    return %c0_i32, %c0_i32_0 : i32, i32
  }
  func.func @transform_2(%arg0: i32) -> (i32, i32) {
    %c0_i32 = arith.constant 0 : i32
    %c0_i32_0 = arith.constant 0 : i32
    %c0_i32_1 = arith.constant 0 : i32
    return %c0_i32, %c0_i32_0 : i32, i32
  }
  func.func @transform_3(%arg0: i32) -> (i32, i32) {
    %c0_i32 = arith.constant 0 : i32
    %c0_i32_0 = arith.constant 0 : i32
    return %c0_i32, %arg0 : i32, i32
  }
  func.func @transform_4(%arg0: i32) -> (i32, i32) {
    %c0_i32 = arith.constant 0 : i32
    %c0_i32_0 = arith.constant 0 : i32
    return %arg0, %c0_i32 : i32, i32
  }
}

</mosaic_0001>

<bundles_post_ra>
// kernel: tpu_custom_call.1
= control target key start
LH: loop header
LB: loop body
LE: loop exit
PB: predicated region body
PF: predicated region fallthrough
CT: control target
= control target key end

     0   :  { %vm98_vm0 = vcmask 261120   ;;  %s1090_s0 = inlined_call_operand.vmem [shape: bf16[128,32], index: 0, kind: input, shape index: {}]   ;;  %s1091_s1 = inlined_call_operand.vmem [shape: bf16[16,32], index: 1, kind: input, shape index: {}]   ;;  %s1092_s2 = inlined_call_operand.vmem [shape: bf16[8,16], index: 2, kind: input, shape index: {}]   ;;  %s1093_s3 = inlined_call_operand.hbm [shape: bf16[8,128], index: 3, kind: output, shape index: {0}]   ;;  %s1094_s4 = inlined_call_operand.vmem [shape: bf16[128,16], index: 4, kind: output, shape index: {1}]  }
   0x1   :  { %v679_v0 = vld [vmem:[%s1091_s1] sm:$0xff]   ;;  %v21_v3 = vld [vmem:[%s1090_s0 + $0x8] sm:$0xf]  ;;  %v22_v7 = vld [vmem:[%s1090_s0 + $0xc] sm:$0xf] }
   0x2   :  { %v19_v1 = vld [vmem:[%s1090_s0] sm:$0xf]  ;;  %v20_v2 = vld [vmem:[%s1090_s0 + $0x4] sm:$0xf]  ;;  %675 = vmatprep.subr.msk.bf16.mxu0 %vm98_vm0, %v679_v0  ;;  %v124_v4 = vsel %vm98_vm0, %v679_v0, 0 }
   0x3   :  { %v35_v5 = vmul.bf16 1043676725, %v19_v1  ;;  %v36_v6 = vmul.bf16 1043676725, %v20_v2  ;;  %638 = vmatpush3.bf16.xpose.msra.mxu0 %v124_v4  ;;  %v37_v8 = vmul.bf16 1043676725, %v21_v3 }
   0x4   :  { %v23_v9 = vld [vmem:[%s1090_s0 + $0x10] sm:$0xf]  ;;  %v38_v11 = vmul.bf16 1043676725, %v22_v7  ;;  %v24_v12 = vld [vmem:[%s1090_s0 + $0x14] sm:$0xf] }
   0x5   :  { %v569_v10 = vcombine.low %v35_v5, %v36_v6  ;;  %v39_v13 = vmul.bf16 1043676725, %v23_v9  ;;  %v40_v14 = vmul.bf16 1043676725, %v24_v12  ;;  %v25_v17 = vld [vmem:[%s1090_s0 + $0x18] sm:$0xf] }
   0x6   :  { %v570_v15 = vcombine.low %v37_v8, %v38_v11  ;;  %v26_v18 = vld [vmem:[%s1090_s0 + $0x1c] sm:$0xf]  ;;  %v27_v19 = vld [vmem:[%s1090_s0 + $0x20] sm:$0xf]  ;;  %v28_v20 = vld [vmem:[%s1090_s0 + $0x24] sm:$0xf] }
   0x7   :  { %639 = vmatprep.mubr.msk.bf16.mxu0 %vm98_vm0, %v569_v10  ;;  %v571_v16 = vcombine.low %v39_v13, %v40_v14  ;;  %v41_v21 = vmul.bf16 1043676725, %v25_v17  ;;  %v42_v22 = vmul.bf16 1043676725, %v26_v18  ;;  %v43_v23 = vmul.bf16 1043676725, %v27_v19 }
   0x8   :  { %v44_v24 = vmul.bf16 1043676725, %v28_v20 }
   0xa   :  { %640 = vmatmul.mubr.msk.bf16.vlgmr.msra.gmra.mrb[0].mxu0 %vm98_vm0, %v570_v15 }
   0xb   :  { %643 = vmatprep.mubr.msk.bf16.mxu0 %vm98_vm0, %v571_v16 }
   0xc   :  { %10 = vsyncpa [#allocation3], 0  ;;  %v572_v25 = vcombine.low %v41_v21, %v42_v22  ;;  %v573_v26 = vcombine.low %v43_v23, %v44_v24  ;;  %v29_v27 = vld [vmem:[%s1090_s0 + $0x28] sm:$0xf]  ;;  %v30_v28 = vld [vmem:[%s1090_s0 + $0x2c] sm:$0xf] }
   0xd   :  { %v31_v29 = vld [vmem:[%s1090_s0 + $0x30] sm:$0xf]  ;;  %v32_v30 = vld [vmem:[%s1090_s0 + $0x34] sm:$0xf]  ;;  %v45_v31 = vmul.bf16 1043676725, %v29_v27 }
   0xe   :  { %v46_v32 = vmul.bf16 1043676725, %v30_v28  ;;  %v47_v33 = vmul.bf16 1043676725, %v31_v29  ;;  %v48_v34 = vmul.bf16 1043676725, %v32_v30 }
   0xf   :  { %v33_v37 = vld [vmem:[%s1090_s0 + $0x38] sm:$0xf]  ;;  %v34_v38 = vld [vmem:[%s1090_s0 + $0x3c] sm:$0xf]  ;;  %vm223_vm1 = vcmask 130048   ;;  %vm769_vm2 = vmmov 0  }
  0x10   :  { %v574_v35 = vcombine.low %v45_v31, %v46_v32  ;;  %v575_v36 = vcombine.low %v47_v33, %v48_v34  ;;  %v49_v39 = vmul.bf16 1043676725, %v33_v37  ;;  %v50_v40 = vmul.bf16 1043676725, %v34_v38  ;;  %s770_s25 = smov [#allocation2]  }
  0x11   :  { %vm464_vm3 = vcmask 125952   ;;  %s557_s26 = sshll.u32 %s770_s25, 4  ;;  %s558_s26 = int_to_ptr.vmem [resolvable:$true] %s557_s26 }
  0x12   :  { %644 = vmatmul.mubr.msk.bf16.gmra.mrb[4].mxu0 %vm98_vm0, %v572_v25  ;;  %v576_v41 = vcombine.low %v49_v39, %v50_v40  ;;  %s744_s27 = scalar_lea.vmem %s558_s26, 64  ;;  %p749_p1 = scmp.lt.s32.totalorder %s558_s26, %s558_s26 }
  0x13   :  { %647 = vmatprep.mubr.msk.bf16.mxu0 %vm98_vm0, %v573_v26  ;;  %p745_p0 = scmp.ne.s32.totalorder %s558_s26, %s744_s27  ;;  %p750_p2 = scmp.lt.s32.totalorder %s744_s27, %s744_s27 }
  0x15   :  { %p751_p3 = por %p750_p2, %p749_p1 }
  0x17   :  { %p752_p4 = pnand %p751_p3, %p745_p0 }
  0x1a   :  { %648 = vmatmul.mubr.msk.bf16.gmra.mrb[8].mxu0 %vm98_vm0, %v574_v35 }
  0x1b   :  { %651 = vmatprep.mubr.msk.bf16.mxu0 %vm98_vm0, %v575_v36 }
  0x22   :  { %652 = vmatmul.mubr.msk.bf16.gmra.mrb[12].mxu0 %vm98_vm0, %v576_v41 }
  0xdd   :  { %v641_v42 = vpop.f32.mrb[0].mxu0 }
  0xde   :  { %v160_v43 = vpop.f32.mrb[1].mxu0  ;;  %v230_v44 = vsel %vm223_vm1, %v641_v42, -inf }
  0xdf   :  { %231 = vmax.xlane.f32.xlu1 %v230_v44  ;;  %v642_v45 = vpop.f32.mrb[2].mxu0  ;;  %v224_v46 = vsel %vm223_vm1, %v160_v43, -inf }
  0xe0   :  { %225 = vmax.xlane.f32.xlu0 %v224_v46  ;;  %v163_v47 = vpop.f32.mrb[3].mxu0  ;;  %v233_v48 = vsel %vm223_vm1, %v642_v45, -inf }
  0xe1   :  { %v227_v49 = vsel %vm223_vm1, %v163_v47, -inf }
  0xe3   :  { %234 = vmax.xlane.f32.xlu1 %v233_v48 }
  0xe4   :  { %228 = vmax.xlane.f32.xlu0 %v227_v49 }
  0xe5   :  { %v861_v50 = vpop.f32.mrb[4].mxu0 }
  0xe6   :  { %v176_v51 = vpop.f32.mrb[5].mxu0  ;;  %v242_v56 = vsel %vm223_vm1, %v861_v50, -inf }
  0xe7   :  { %v863_v52 = vpop.f32.mrb[6].mxu0  ;;  %v236_v53 = vsel %vm223_vm1, %v176_v51, -inf }
  0xe8   :  { %237 = vmax.xlane.f32.xlu0 %v236_v53  ;;  %v179_v54 = vpop.f32.mrb[7].mxu0  ;;  %v245_v57 = vsel %vm223_vm1, %v863_v52, -inf }
  0xe9   :  { %v239_v55 = vsel %vm223_vm1, %v179_v54, -inf }
  0xea   :  { %240 = vmax.xlane.f32.xlu1 %v239_v55 }
  0xec   :  { %243 = vmax.xlane.f32.xlu0 %v242_v56 }
  0xed   :  { %v871_v58 = vpop.f32.mrb[8].mxu0 }
  0xee   :  { %246 = vmax.xlane.f32.xlu1 %v245_v57  ;;  %v873_v59 = vpop.f32.mrb[9].mxu0  ;;  %v254_v0 = vsel %vm223_vm1, %v871_v58, -inf }
  0xef   :  { %v875_v60 = vpop.f32.mrb[10].mxu0  ;;  %v248_v61 = vsel %vm223_vm1, %v873_v59, -inf }
  0xf0   :  { %249 = vmax.xlane.f32.xlu0 %v248_v61  ;;  %v879_v62 = vpop.f32.mrb[11].mxu0  ;;  %v257_v1 = vsel %vm223_vm1, %v875_v60, -inf }
  0xf1   :  { %v251_v63 = vsel %vm223_vm1, %v879_v62, -inf }
  0xf2   :  { %252 = vmax.xlane.f32.xlu1 %v251_v63 }
  0xf4   :  { %255 = vmax.xlane.f32.xlu0 %v254_v0 }
  0xf5   :  { %v887_v2 = vpop.f32.mrb[12].mxu0 }
  0xf6   :  { %258 = vmax.xlane.f32.xlu1 %v257_v1  ;;  %v889_v3 = vpop.f32.mrb[13].mxu0  ;;  %v266_v8 = vsel %vm223_vm1, %v887_v2, -inf }
  0xf7   :  { %v891_v4 = vpop.f32.mrb[14].mxu0  ;;  %v260_v5 = vsel %vm223_vm1, %v889_v3, -inf }
  0xf8   :  { %261 = vmax.xlane.f32.xlu0 %v260_v5  ;;  %v895_v6 = vpop.f32.mrb[15].mxu0  ;;  %v269_v9 = vsel %vm223_vm1, %v891_v4, -inf }
  0xf9   :  { %v263_v7 = vsel %vm223_vm1, %v895_v6, -inf }
  0xfa   :  { %264 = vmax.xlane.f32.xlu1 %v263_v7 }
  0xfc   :  { %267 = vmax.xlane.f32.xlu0 %v266_v8 }
  0xfe   :  { %270 = vmax.xlane.f32.xlu1 %v269_v9 }
 0x16c   :  { %v232_v10 = vpop.xlane.xlu1 %231 }
 0x16d   :  { %v274_v11 = vsub.f32 %v641_v42, %v232_v10  ;;  %v226_v12 = vpop.xlane.xlu0 %225 }
 0x16e   :  { %v272_v13 = vsub.f32 %v160_v43, %v226_v12 }
 0x16f   :  { %v292_v14 = vmul.f32 1.442695, %v274_v11 }
 0x170   :  { %v288_v15 = vmul.f32 1.442695, %v272_v13  ;;  %v235_v16 = vpop.xlane.xlu1 %234 }
 0x171   :  { %v275_v17 = vsub.f32 %v642_v45, %v235_v16  ;;  %v229_v18 = vpop.xlane.xlu0 %228 }
 0x172   :  { %680 = vpow2.f32 %v288_v15  ;;  %v273_v19 = vsub.f32 %v163_v47, %v229_v18 }
 0x173   :  { %682 = vpow2.f32 %v292_v14  ;;  %v294_v20 = vmul.f32 1.442695, %v275_v17 }
 0x174   :  { %v290_v21 = vmul.f32 1.442695, %v273_v19 }
 0x175   :  { %v238_v22 = vpop.xlane.xlu0 %237 }
 0x176   :  { %684 = vpow2.f32 %v290_v21  ;;  %v276_v23 = vsub.f32 %v176_v51, %v238_v22 }
 0x177   :  { %v241_v24 = vpop.xlane.xlu1 %240  ;;  %686 = vpow2.f32 %v294_v20 }
 0x178   :  { %v296_v25 = vmul.f32 1.442695, %v276_v23  ;;  %v277_v26 = vsub.f32 %v179_v54, %v241_v24 }
 0x179   :  { %v244_v27 = vpop.xlane.xlu0 %243 }
 0x17a   :  { %688 = vpow2.f32 %v296_v25  ;;  %v298_v28 = vmul.f32 1.442695, %v277_v26  ;;  %v278_v29 = vsub.f32 %v861_v50, %v244_v27  ;;  %v768_v26 = vmov 0.0  }
 0x17b   :  { %v247_v30 = vpop.xlane.xlu1 %246  ;;  %655 = vmatprep.subr.bf16.mxu1 %v768_v26  ;;  %671 = vmatprep.mubr.msk.bf16.mxu1 %vm769_vm2, %v768_v26 }
 0x17c   :  { %v904_v31 = vpop.eup %680  ;;  %690 = vpow2.f32 %v298_v28  ;;  %v300_v32 = vmul.f32 1.442695, %v278_v29  ;;  %v279_v33 = vsub.f32 %v863_v52, %v247_v30 }
 0x17d   :  { %v250_v34 = vpop.xlane.xlu0 %249  ;;  %v320_v35 = vsel %vm223_vm1, %v904_v31, 0.0  ;;  %v909_v36 = vpop.eup %682 }
 0x17e   :  { %692 = vpow2.f32 %v300_v32  ;;  %v302_v37 = vmul.f32 1.442695, %v279_v33  ;;  %v280_v38 = vsub.f32 %v873_v59, %v250_v34  ;;  %321 = vadd.xlane.f32.xlu0 %v320_v35  ;;  %v326_v44 = vsel %vm223_vm1, %v909_v36, 0.0 }
 0x17f   :  { %v253_v39 = vpop.xlane.xlu1 %252 }
 0x180   :  { %v912_v40 = vpop.eup %684  ;;  %694 = vpow2.f32 %v302_v37  ;;  %v304_v41 = vmul.f32 1.442695, %v280_v38  ;;  %v281_v42 = vsub.f32 %v879_v62, %v253_v39 }
 0x181   :  { %v256_v43 = vpop.xlane.xlu0 %255  ;;  %v323_v45 = vsel %vm223_vm1, %v912_v40, 0.0  ;;  %v919_v46 = vpop.eup %686 }
 0x182   :  { %696 = vpow2.f32 %v304_v41  ;;  %v306_v47 = vmul.f32 1.442695, %v281_v42  ;;  %v282_v48 = vsub.f32 %v871_v58, %v256_v43  ;;  %327 = vadd.xlane.f32.xlu0 %v326_v44  ;;  %324 = vadd.xlane.f32.xlu1 %v323_v45  ;;  %v329_v55 = vsel %vm223_vm1, %v919_v46, 0.0 }
 0x183   :  { %v259_v49 = vpop.xlane.xlu1 %258 }
 0x184   :  { %v922_v50 = vpop.eup %688  ;;  %698 = vpow2.f32 %v306_v47  ;;  %v308_v51 = vmul.f32 1.442695, %v282_v48  ;;  %v283_v52 = vsub.f32 %v875_v60, %v259_v49 }
 0x185   :  { %v262_v53 = vpop.xlane.xlu0 %261  ;;  %v332_v54 = vsel %vm223_vm1, %v922_v50, 0.0 }
 0x186   :  { %v929_v56 = vpop.eup %690  ;;  %700 = vpow2.f32 %v308_v51  ;;  %v310_v57 = vmul.f32 1.442695, %v283_v52  ;;  %v284_v58 = vsub.f32 %v889_v3, %v262_v53  ;;  %333 = vadd.xlane.f32.xlu0 %v332_v54  ;;  %330 = vadd.xlane.f32.xlu1 %v329_v55 }
 0x187   :  { %v265_v59 = vpop.xlane.xlu1 %264  ;;  %v335_v1 = vsel %vm223_vm1, %v929_v56, 0.0 }
 0x188   :  { %v932_v61 = vpop.eup %692  ;;  %702 = vpow2.f32 %v310_v57  ;;  %v312_v60 = vmul.f32 1.442695, %v284_v58  ;;  %v285_v62 = vsub.f32 %v895_v6, %v265_v59 }
 0x189   :  { %v268_v63 = vpop.xlane.xlu0 %267  ;;  %v338_v0 = vsel %vm223_vm1, %v932_v61, 0.0 }
 0x18a   :  { %v939_v5 = vpop.eup %694  ;;  %704 = vpow2.f32 %v312_v60  ;;  %v314_v3 = vmul.f32 1.442695, %v285_v62  ;;  %v286_v7 = vsub.f32 %v887_v2, %v268_v63  ;;  %339 = vadd.xlane.f32.xlu0 %v338_v0  ;;  %336 = vadd.xlane.f32.xlu1 %v335_v1 }
 0x18b   :  { %v271_v8 = vpop.xlane.xlu1 %270  ;;  %v341_v12 = vsel %vm223_vm1, %v939_v5, 0.0 }
 0x18c   :  { %v942_v9 = vpop.eup %696  ;;  %706 = vpow2.f32 %v314_v3  ;;  %v316_v6 = vmul.f32 1.442695, %v286_v7  ;;  %v287_v10 = vsub.f32 %v891_v4, %v271_v8 }
 0x18d   :  { %v344_v11 = vsel %vm223_vm1, %v942_v9, 0.0 }
 0x18e   :  { %v949_v13 = vpop.eup %698  ;;  %708 = vpow2.f32 %v316_v6  ;;  %v318_v14 = vmul.f32 1.442695, %v287_v10  ;;  %345 = vadd.xlane.f32.xlu0 %v344_v11  ;;  %342 = vadd.xlane.f32.xlu1 %v341_v12 }
 0x18f   :  { %v347_v4 = vsel %vm223_vm1, %v949_v13, 0.0 }
 0x190   :  { %v951_v2 = vpop.eup %700  ;;  %710 = vpow2.f32 %v318_v14 }
 0x191   :  { %v350_v15 = vsel %vm223_vm1, %v951_v2, 0.0 }
 0x192   :  { %v957_v16 = vpop.eup %702  ;;  %351 = vadd.xlane.f32.xlu0 %v350_v15  ;;  %348 = vadd.xlane.f32.xlu1 %v347_v4 }
 0x193   :  { %v353_v19 = vsel %vm223_vm1, %v957_v16, 0.0 }
 0x194   :  { %v959_v17 = vpop.eup %704 }
 0x195   :  { %v356_v18 = vsel %vm223_vm1, %v959_v17, 0.0 }
 0x196   :  { %v965_v20 = vpop.eup %706  ;;  %357 = vadd.xlane.f32.xlu0 %v356_v18  ;;  %354 = vadd.xlane.f32.xlu1 %v353_v19 }
 0x197   :  { %v359_v23 = vsel %vm223_vm1, %v965_v20, 0.0 }
 0x198   :  { %v967_v21 = vpop.eup %708 }
 0x199   :  { %v362_v22 = vsel %vm223_vm1, %v967_v21, 0.0 }
 0x19a   :  { %v973_v24 = vpop.eup %710  ;;  %363 = vadd.xlane.f32.xlu0 %v362_v22  ;;  %360 = vadd.xlane.f32.xlu1 %v359_v23 }
 0x19b   :  { %v365_v25 = vsel %vm223_vm1, %v973_v24, 0.0 }
 0x19e   :  { %366 = vadd.xlane.f32.xlu1 %v365_v25 }
 0x20b   :  { %v322_v27 = vpop.xlane.xlu0 %321 }
 0x20c   :  { %712 = vrcp.f32 %v322_v27 }
 0x20f   :  { %v328_v28 = vpop.xlane.xlu0 %327  ;;  %v325_v29 = vpop.xlane.xlu1 %324 }
 0x210   :  { %714 = vrcp.f32 %v328_v28 }
 0x211   :  { %716 = vrcp.f32 %v325_v29 }
 0x213   :  { %v334_v30 = vpop.xlane.xlu0 %333  ;;  %v331_v32 = vpop.xlane.xlu1 %330 }
 0x214   :  { %718 = vrcp.f32 %v334_v30 }
 0x215   :  { %720 = vrcp.f32 %v331_v32 }
 0x216   :  { %v713_v33 = vpop.eup %712 }
 0x217   :  { %v340_v34 = vpop.xlane.xlu0 %339  ;;  %v337_v35 = vpop.xlane.xlu1 %336  ;;  %v384_v37 = vmul.f32 %v713_v33, %v904_v31 }
 0x218   :  { %722 = vrcp.f32 %v340_v34 }
 0x219   :  { %724 = vrcp.f32 %v337_v35  ;;  %v603_v38 = vpack.c.bf16 %v384_v37, %v384_v37 }
 0x21a   :  { %v715_v39 = vpop.eup %714 }
 0x21b   :  { %v717_v41 = vpop.eup %716  ;;  %v346_v42 = vpop.xlane.xlu0 %345  ;;  %465 = vst.msk [vmem:[%s1094_s4] sm:$0xf] %vm464_vm3, %v603_v38  ;;  %v386_v44 = vmul.f32 %v715_v39, %v909_v36 }
 0x21c   :  { %v343_v43 = vpop.xlane.xlu1 %342  ;;  %726 = vrcp.f32 %v346_v42  ;;  %v385_v45 = vmul.f32 %v717_v41, %v912_v40 }
 0x21d   :  { %728 = vrcp.f32 %v343_v43  ;;  %v605_v31 = vpack.c.bf16 %v386_v44, %v386_v44 }
 0x21e   :  { %v719_v47 = vpop.eup %718  ;;  %v400_v48 = vpack.c.bf16 %v385_v45, %v384_v37  ;;  %v604_v49 = vpack.c.bf16 %v385_v45, %v385_v45 }
 0x21f   :  { %v721_v51 = vpop.eup %720  ;;  %v352_v52 = vpop.xlane.xlu0 %351  ;;  %467 = vst.msk [vmem:[%s1094_s4 + $0x8] sm:$0xf] %vm464_vm3, %v605_v31  ;;  %v388_v54 = vmul.f32 %v719_v47, %v922_v50  ;;  %v481_v47 = vld [vmem:[%s1092_s2] sm:$0xf] }
 0x220   :  { %v349_v53 = vpop.xlane.xlu1 %348  ;;  %730 = vrcp.f32 %v352_v52  ;;  %466 = vst.msk [vmem:[%s1094_s4 + $0x4] sm:$0xf] %vm464_vm3, %v604_v49  ;;  %v486_v36 = vsel %vm223_vm1, %v400_v48, 0  ;;  %v387_v40 = vmul.f32 %v721_v51, %v919_v46 }
 0x221   :  { %732 = vrcp.f32 %v349_v53  ;;  %656 = vmatpush3.bf16.xpose.msra.mxu1 %v486_v36  ;;  %v607_v55 = vpack.c.bf16 %v388_v54, %v388_v54 }
 0x222   :  { %v723_v57 = vpop.eup %722  ;;  %657 = vmatprep.subr.bf16.mxu1 %v768_v26  ;;  %v606_v58 = vpack.c.bf16 %v387_v40, %v387_v40  ;;  %v401_v63 = vpack.c.bf16 %v387_v40, %v386_v44 }
 0x223   :  { %v725_v59 = vpop.eup %724  ;;  %v358_v60 = vpop.xlane.xlu0 %357  ;;  %469 = vst.msk [vmem:[%s1094_s4 + $0x10] sm:$0xf] %vm464_vm3, %v607_v55  ;;  %v390_v62 = vmul.f32 %v723_v57, %v932_v61 }
 0x224   :  { %v355_v50 = vpop.xlane.xlu1 %354  ;;  %734 = vrcp.f32 %v358_v60  ;;  %468 = vst.msk [vmem:[%s1094_s4 + $0xc] sm:$0xf] %vm464_vm3, %v606_v58  ;;  %v389_v46 = vmul.f32 %v725_v59, %v929_v56  ;;  %v489_v10 = vsel %vm223_vm1, %v401_v63, 0 }
 0x225   :  { %736 = vrcp.f32 %v355_v50  ;;  %v609_v0 = vpack.c.bf16 %v390_v62, %v390_v62 }
 0x226   :  { %v727_v1 = vpop.eup %726  ;;  %v608_v3 = vpack.c.bf16 %v389_v46, %v389_v46  ;;  %v402_v18 = vpack.c.bf16 %v389_v46, %v388_v54 }
 0x227   :  { %v729_v7 = vpop.eup %728  ;;  %v364_v8 = vpop.xlane.xlu0 %363  ;;  %471 = vst.msk [vmem:[%s1094_s4 + $0x18] sm:$0xf] %vm464_vm3, %v609_v0  ;;  %v392_v61 = vmul.f32 %v727_v1, %v942_v9 }
 0x228   :  { %v361_v6 = vpop.xlane.xlu1 %360  ;;  %738 = vrcp.f32 %v364_v8  ;;  %470 = vst.msk [vmem:[%s1094_s4 + $0x14] sm:$0xf] %vm464_vm3, %v608_v3  ;;  %v391_v56 = vmul.f32 %v729_v7, %v939_v5  ;;  %v492_v27 = vsel %vm223_vm1, %v402_v18, 0 }
 0x229   :  { %740 = vrcp.f32 %v361_v6  ;;  %658 = vmatpush3.bf16.xpose.msra.mxu1 %v489_v10  ;;  %v611_v11 = vpack.c.bf16 %v392_v61, %v392_v61 }
 0x22a   :  { %v731_v12 = vpop.eup %730  ;;  %659 = vmatprep.subr.bf16.mxu1 %v768_v26  ;;  %v610_v14 = vpack.c.bf16 %v391_v56, %v391_v56  ;;  %v403_v33 = vpack.c.bf16 %v391_v56, %v390_v62 }
 0x22b   :  { %v733_v15 = vpop.eup %732  ;;  %473 = vst.msk [vmem:[%s1094_s4 + $0x20] sm:$0xf] %vm464_vm3, %v611_v11  ;;  %v394_v9 = vmul.f32 %v731_v12, %v951_v2 }
 0x22c   :  { %v367_v4 = vpop.xlane.xlu1 %366  ;;  %472 = vst.msk [vmem:[%s1094_s4 + $0x1c] sm:$0xf] %vm464_vm3, %v610_v14  ;;  %v393_v5 = vmul.f32 %v733_v15, %v949_v13 }
 0x22d   :  { %742 = vrcp.f32 %v367_v4  ;;  %v613_v19 = vpack.c.bf16 %v394_v9, %v394_v9 }
 0x22e   :  { %v735_v22 = vpop.eup %734  ;;  %v612_v23 = vpack.c.bf16 %v393_v5, %v393_v5 }
 0x22f   :  { %v737_v25 = vpop.eup %736  ;;  %475 = vst.msk [vmem:[%s1094_s4 + $0x28] sm:$0xf] %vm464_vm3, %v613_v19  ;;  %v396_v2 = vmul.f32 %v735_v22, %v959_v17 }
 0x230   :  { %474 = vst.msk [vmem:[%s1094_s4 + $0x24] sm:$0xf] %vm464_vm3, %v612_v23  ;;  %v395_v13 = vmul.f32 %v737_v25, %v957_v16 }
 0x231   :  { %660 = vmatpush3.bf16.xpose.msra.mxu1 %v492_v27  ;;  %v615_v28 = vpack.c.bf16 %v396_v2, %v396_v2 }
 0x232   :  { %v739_v29 = vpop.eup %738  ;;  %661 = vmatprep.subr.bf16.mxu1 %v768_v26  ;;  %v614_v30 = vpack.c.bf16 %v395_v13, %v395_v13  ;;  %v405_v41 = vpack.c.bf16 %v395_v13, %v394_v9 }
 0x233   :  { %v741_v32 = vpop.eup %740  ;;  %477 = vst.msk [vmem:[%s1094_s4 + $0x30] sm:$0xf] %vm464_vm3, %v615_v28  ;;  %v398_v17 = vmul.f32 %v739_v29, %v967_v21  ;;  %v495_v21 = vsel %vm223_vm1, %v403_v33, 0 }
 0x234   :  { %476 = vst.msk [vmem:[%s1094_s4 + $0x2c] sm:$0xf] %vm464_vm3, %v614_v30  ;;  %v397_v16 = vmul.f32 %v741_v32, %v965_v20  ;;  %v404_v20 = vpack.c.bf16 %v393_v5, %v392_v61  ;;  %v501_v42 = vsel %vm223_vm1, %v405_v41, 0 }
 0x235   :  { %v617_v34 = vpack.c.bf16 %v398_v17, %v398_v17 }
 0x236   :  { %v616_v37 = vpack.c.bf16 %v397_v16, %v397_v16  ;;  %v406_v43 = vpack.c.bf16 %v397_v16, %v396_v2 }
 0x237   :  { %v743_v35 = vpop.eup %742  ;;  %479 = vst.msk [vmem:[%s1094_s4 + $0x38] sm:$0xf] %vm464_vm3, %v617_v34 }
 0x238   :  { %v399_v38 = vmul.f32 %v743_v35, %v973_v24  ;;  %478 = vst.msk [vmem:[%s1094_s4 + $0x34] sm:$0xf] %vm464_vm3, %v616_v37  ;;  %v498_v24 = vsel %vm223_vm1, %v404_v20, 0  ;;  %v504_v44 = vsel %vm223_vm1, %v406_v43, 0 }
 0x239   :  { %662 = vmatpush3.bf16.xpose.msra.mxu1 %v495_v21 }
 0x23a   :  { %v618_v39 = vpack.c.bf16 %v399_v38, %v399_v38  ;;  %663 = vmatprep.subr.bf16.mxu1 %v768_v26  ;;  %v407_v45 = vpack.c.bf16 %v399_v38, %v398_v17 }
 0x23c   :  { %480 = vst.msk [vmem:[%s1094_s4 + $0x3c] sm:$0xf] %vm464_vm3, %v618_v39  ;;  %v507_v31 = vsel %vm223_vm1, %v407_v45, 0 }
 0x241   :  { %664 = vmatpush3.bf16.xpose.msra.mxu1 %v498_v24 }
 0x242   :  { %665 = vmatprep.subr.bf16.mxu1 %v768_v26 }
 0x249   :  { %666 = vmatpush3.bf16.xpose.msra.mxu1 %v501_v42 }
 0x24a   :  { %667 = vmatprep.subr.bf16.mxu1 %v768_v26 }
 0x251   :  { %668 = vmatpush3.bf16.xpose.msra.mxu1 %v504_v44 }
 0x252   :  { %669 = vmatprep.subr.bf16.mxu1 %v768_v26 }
 0x259   :  { %670 = vmatpush3.bf16.xpose.msra.mxu1 %v507_v31 }
 0x260   :  { %672 = vmatmul.mubr.msk.bf16.vlgmr.msra.gmra.mrb[0].mxu1 %vm223_vm1, %v481_v47 }
 0x333   :  { %v543_v48 = vpop.f32.mrb[0].mxu1 }
 0x334   :  { %v549_v49 = vpack.c.bf16 %v543_v48, %v543_v48  ;;  %v673_v51 = vpop.f32.mrb[1].mxu1 }
 0x335   :  { %v546_v52 = vpop.f32.mrb[2].mxu1 }
 0x336   :  { %550 = vst [vmem:[#allocation2] sm:$0xf] %v549_v49  ;;  %v674_v53 = vpop.f32.mrb[3].mxu1 }
 0x337   :  { %755 = shalt.err (!%p752_p4)
}
 0x338   :  { %s756_s29 = scalar_lea.hbm %s1093_s3, 64 }
 0x339   :  { %p757_p5 = scmp.ne.s32.totalorder %s1093_s3, %s756_s29  ;;  %p760_p6 = scmp.lt.u32.totalorder %s756_s29, %s1093_s3 }
 0x33b   :  { %p762_p7 = pnand %p760_p6, %p757_p5 }
 0x33d   :  { %765 = shalt.err (!%p762_p7)
}
 0x33e   :  { %560 = dma.vmem_to_hbm [thread:$0]  %s558_s26, 64, %s1093_s3, [#allocation3]  }
 0x33f   :  { %766 = dma.done.wait [#allocation3], 64  }
 0x340   :  { %767 = vsyncadd [#allocation3], 4294967232 }
 0x341   :  { %568 = vsyncpa [#allocation3], 1 }

</bundles_post_ra>
